<compile_context>
chip_gen: v7x
topology: tpu7x:2x2x1
jax: 0.10.0
libtpu: 0.0.40
codegen_flags: <defaults>
</compile_context>

<pallas_src>
import jax
import jax.numpy as jnp
from jax.experimental import pallas as pl
from jax.experimental.pallas import tpu as pltpu

IN_DIM = 784
HID_DIM = 128
OUT_DIM = 10
OUT_PAD = 128          # lane-dense padded width for the layer-2 matmul
NEG_INF = -1e30        # finite "-inf" baked into the padded bias lanes


def mlp_kernel(x_ref, w1_ref, b1_ref, w2_ref, b2_ref, o_ref):
    # ---- Layer 1: (tb, 784) x (784, 128) on the MXU, f32 accumulation ----
    # In-kernel bf16 cast (VPU, free under the DMA roofline).
    x = x_ref[...].astype(jnp.bfloat16)
    h = jnp.dot(x, w1_ref[...], preferred_element_type=jnp.float32)
    h = h + b1_ref[...]                                   # (tb,128)+(1,128)
    # sigmoid: exp + approx reciprocal both land on the EUP slot.
    h = pl.reciprocal(1.0 + jnp.exp(-h), approx=True)

    # ---- Layer 2: lane-dense 128-wide matmul; padded lanes carry a -1e30
    # bias (W2 padded columns are zero), so no explicit mask is needed. ----
    logits = jnp.dot(h.astype(w2_ref.dtype), w2_ref[...],
                     preferred_element_type=jnp.float32)
    logits = logits + b2_ref[...]                         # (tb,128)+(1,128)

    # Numerically stable softmax; exact divide keeps row sums tight.
    m = jnp.max(logits, axis=-1, keepdims=True)
    e = jnp.exp(logits - m)
    denom = jnp.sum(e, axis=-1, keepdims=True)
    probs = e / denom

    # Store only the 10 real columns (lane-masked store, 12.8x less HBM).
    o_ref[...] = probs[:, :OUT_DIM].astype(o_ref.dtype)


def prepare_params(w1, b1, w2, b2, *, compute_dtype=jnp.bfloat16):
    """Hoisted once-per-model param prep: bf16 cast + lane padding.

    w1: (784,128), b1: (128,), w2: (128,10), b2: (10,)  (i.e. torch W^T).
    """
    w1_c = w1.astype(compute_dtype)
    b1_2d = b1.reshape(1, HID_DIM).astype(jnp.float32)
    # Zero-pad W2 columns to 128; poison the padded bias lanes so padded
    # logits are -1e30 (masking for free).
    w2_p = jnp.zeros((HID_DIM, OUT_PAD), compute_dtype).at[:, :OUT_DIM].set(
        w2.astype(compute_dtype))
    b2_p = jnp.full((1, OUT_PAD), NEG_INF, jnp.float32).at[:, :OUT_DIM].set(
        b2.astype(jnp.float32))
    return w1_c, b1_2d, w2_p, b2_p


def mlp_forward(x, w1_c, b1_2d, w2_p, b2_p, *, tile_b=1024):
    """x: (B, 784) f32 -> (B, 10) f32 softmax probabilities."""
    B = x.shape[0]

    # Batch tile: big enough to amortize the ~0.35 us per-step pipeline
    # overhead, but capped so the grid has >=2 blocks when B permits (so the
    # "parallel" batch axis shards across both v7x TensorCores). f32 x only
    # needs sublane (8) alignment.
    if B >= 16:
        two_block_cap = ((pl.cdiv(B, 2) + 7) // 8) * 8
        tb = min(tile_b, two_block_cap)
    else:
        tb = max(8, ((B + 7) // 8) * 8)
    n_blocks = pl.cdiv(B, tb)
    b_pad = n_blocks * tb
    if b_pad != B:
        # Rare path (B not a multiple of 8 / tb); padded rows are dropped below.
        x = jnp.pad(x, ((0, b_pad - B), (0, 0)))

    out = pl.pallas_call(
        mlp_kernel,
        out_shape=jax.ShapeDtypeStruct((b_pad, OUT_DIM), jnp.float32),
        grid_spec=pltpu.PrefetchScalarGridSpec(
            num_scalar_prefetch=0,
            grid=(n_blocks,),
            in_specs=[
                # x: tiled over batch, full feature dim, f32 straight from HBM.
                pl.BlockSpec((tb, IN_DIM), lambda i: (i, 0)),
                # Weights / biases: resident, constant block index across the
                # grid (Pallas skips re-fetching when the index is unchanged).
                # (Single-buffering them would save ~230 KB VMEM but is not
                #  needed at tb<=2048; kept default for robustness.)
                pl.BlockSpec((IN_DIM, HID_DIM), lambda i: (0, 0)),
                pl.BlockSpec((1, HID_DIM), lambda i: (0, 0)),
                pl.BlockSpec((HID_DIM, OUT_PAD), lambda i: (0, 0)),
                pl.BlockSpec((1, OUT_PAD), lambda i: (0, 0)),
            ],
            # Narrow (tb, 10) output block == full width of the (b_pad, 10)
            # array -> no padded garbage written, no post-kernel slice.
            out_specs=pl.BlockSpec((tb, OUT_DIM), lambda i: (i, 0)),
        ),
        compiler_params=pltpu.CompilerParams(
            dimension_semantics=("parallel",),
            # VMEM @ tb=1024: 2x3.2MB x-tile + weights + tiny output, well
            # under default scoped limits (16MB v5e, 32MB v6e/v7x). Set
            # vmem_limit_bytes only if tile_b is pushed past ~2048 (watch
            # v7x's 64 MiB physical VMEM).
        ),
    )(x, w1_c, b1_2d, w2_p, b2_p)

    return out if b_pad == B else out[:B]


def reference_forward(x, w1, b1, w2, b2):
    h = jax.nn.sigmoid(x @ w1 + b1)
    logits = h @ w2 + b2
    return jax.nn.softmax(logits, axis=-1).reshape(-1, OUT_DIM)


def reference_forward_bf16(x, w1, b1, w2, b2):
    # Same math with the same bf16 rounding the kernel applies (f32 accumulate).
    bf = lambda a: a.astype(jnp.bfloat16).astype(jnp.float32)
    h = jax.nn.sigmoid(bf(x) @ bf(w1) + b1)
    logits = bf(h) @ bf(w2) + b2
    return jax.nn.softmax(logits, axis=-1).reshape(-1, OUT_DIM)


if __name__ == "__main__":
    key = jax.random.PRNGKey(0)
    kx, kw1, kb1, kw2, kb2 = jax.random.split(key, 5)

    B = 64
    x = jax.random.normal(kx, (B, IN_DIM), dtype=jnp.float32)

    # Deterministic param init (uniform, like torch's default Linear init).
    bound1 = 1.0 / (IN_DIM ** 0.5)
    w1 = jax.random.uniform(kw1, (IN_DIM, HID_DIM), jnp.float32, -bound1, bound1)
    b1 = jax.random.uniform(kb1, (HID_DIM,), jnp.float32, -bound1, bound1)
    bound2 = 1.0 / (HID_DIM ** 0.5)
    w2 = jax.random.uniform(kw2, (HID_DIM, OUT_DIM), jnp.float32, -bound2, bound2)
    b2 = jax.random.uniform(kb2, (OUT_DIM,), jnp.float32, -bound2, bound2)

    # Hoisted param prep (once per model, not per call).
    params = prepare_params(w1, b1, w2, b2)

    out = mlp_forward(x, *params)
    out = jax.block_until_ready(out)

    assert out.shape == (B, OUT_DIM)

    # Loose check against the pure-f32 reference (bf16 compute path).
    ref = reference_forward(x, w1, b1, w2, b2)
    assert jnp.allclose(out, ref, atol=3e-2, rtol=0.0), float(
        jnp.max(jnp.abs(out - ref)))

    # Tight check against a reference with identical bf16 rounding (isolates
    # kernel bugs from dtype precision).
    ref_bf = reference_forward_bf16(x, w1, b1, w2, b2)
    assert jnp.allclose(out, ref_bf, atol=5e-3, rtol=0.0), float(
        jnp.max(jnp.abs(out - ref_bf)))

    # Softmax rows sum to ~1 (exact divide in the kernel).
    assert jnp.allclose(jnp.sum(out, axis=-1), 1.0, atol=1e-3)

    print("KERNEL_OK")
</pallas_src>

<mosaic_0001>
module attributes {stable_mosaic.version = 11 : i64} {
  func.func @mlp_kernel(%arg0: i32, %arg1: memref<32x784xf32, #tpu.memory_space<vmem>>, %arg2: memref<784x128xbf16, #tpu.memory_space<vmem>>, %arg3: memref<1x128xf32, #tpu.memory_space<vmem>>, %arg4: memref<128x128xbf16, #tpu.memory_space<vmem>>, %arg5: memref<1x128xf32, #tpu.memory_space<vmem>>, %arg6: memref<32x10xf32, #tpu.memory_space<vmem>>) attributes {dimension_semantics = [#tpu.dimension_semantics<parallel>], iteration_bounds = array<i64: 2>, scalar_prefetch = 0 : i64, scratch_operands = 0 : i64, tpu.core_type = #tpu.core_type<tc>, window_params = [{transform_indices = @transform_0, window_bounds = array<i64: 32, 784>}, {pipeline_mode = #tpu.pipeline_mode<synchronous>, transform_indices = @transform_1, window_bounds = array<i64: 784, 128>}, {pipeline_mode = #tpu.pipeline_mode<synchronous>, transform_indices = @transform_2, window_bounds = array<i64: 1, 128>}, {pipeline_mode = #tpu.pipeline_mode<synchronous>, transform_indices = @transform_3, window_bounds = array<i64: 128, 128>}, {pipeline_mode = #tpu.pipeline_mode<synchronous>, transform_indices = @transform_4, window_bounds = array<i64: 1, 128>}, {transform_indices = @transform_5, window_bounds = array<i64: 32, 10>}]} {
    %c0 = arith.constant 0 : index
    %c0_0 = arith.constant 0 : index
    %0 = vector.load %arg1[%c0, %c0_0] : memref<32x784xf32, #tpu.memory_space<vmem>>, vector<32x784xf32>
    %1 = arith.truncf %0 : vector<32x784xf32> to vector<32x784xbf16>
    %c0_1 = arith.constant 0 : index
    %c0_2 = arith.constant 0 : index
    %2 = vector.load %arg2[%c0_1, %c0_2] : memref<784x128xbf16, #tpu.memory_space<vmem>>, vector<784x128xbf16>
    %cst = arith.constant dense<0.000000e+00> : vector<32x128xf32>
    %3 = tpu.matmul %1, %2, %cst {dimension_numbers = #tpu.dot_dimension_numbers<[1], [0], [0], [1], [0, 0, 1, 1], [], []>} : vector<32x784xbf16>, vector<784x128xbf16>, vector<32x128xf32> -> vector<32x128xf32>
    %c0_3 = arith.constant 0 : index
    %c0_4 = arith.constant 0 : index
    %4 = vector.load %arg3[%c0_3, %c0_4] : memref<1x128xf32, #tpu.memory_space<vmem>>, vector<1x128xf32>
    %5 = vector.broadcast %4 : vector<1x128xf32> to vector<32x128xf32>
    %6 = arith.addf %3, %5 : vector<32x128xf32>
    %cst_5 = arith.constant 0.000000e+00 : f32
    %7 = vector.broadcast %cst_5 : f32 to vector<32x128xf32>
    %8 = arith.subf %7, %6 : vector<32x128xf32>
    %9 = math.exp %8 : vector<32x128xf32>
    %cst_6 = arith.constant 1.000000e+00 : f32
    %10 = vector.broadcast %cst_6 : f32 to vector<32x128xf32>
    %11 = arith.addf %10, %9 : vector<32x128xf32>
    %12 = tpu.reciprocal %11 {approx = true} : vector<32x128xf32> -> vector<32x128xf32>
    %13 = arith.truncf %12 : vector<32x128xf32> to vector<32x128xbf16>
    %c0_7 = arith.constant 0 : index
    %c0_8 = arith.constant 0 : index
    %14 = vector.load %arg4[%c0_7, %c0_8] : memref<128x128xbf16, #tpu.memory_space<vmem>>, vector<128x128xbf16>
    %cst_9 = arith.constant dense<0.000000e+00> : vector<32x128xf32>
    %15 = tpu.matmul %13, %14, %cst_9 {dimension_numbers = #tpu.dot_dimension_numbers<[1], [0], [0], [1], [0, 0, 1, 1], [], []>} : vector<32x128xbf16>, vector<128x128xbf16>, vector<32x128xf32> -> vector<32x128xf32>
    %c0_10 = arith.constant 0 : index
    %c0_11 = arith.constant 0 : index
    %16 = vector.load %arg5[%c0_10, %c0_11] : memref<1x128xf32, #tpu.memory_space<vmem>>, vector<1x128xf32>
    %17 = vector.broadcast %16 : vector<1x128xf32> to vector<32x128xf32>
    %18 = arith.addf %15, %17 : vector<32x128xf32>
    %cst_12 = arith.constant dense<0xFF800000> : vector<32xf32>
    %19 = vector.multi_reduction <maximumf>, %18, %cst_12 [1] : vector<32x128xf32> to vector<32xf32>
    %20 = vector.shape_cast %19 : vector<32xf32> to vector<32x1xf32>
    %21 = vector.broadcast %20 : vector<32x1xf32> to vector<32x128xf32>
    %22 = arith.subf %18, %21 : vector<32x128xf32>
    %23 = math.exp %22 : vector<32x128xf32>
    %cst_13 = arith.constant dense<0.000000e+00> : vector<32xf32>
    %24 = vector.multi_reduction <add>, %23, %cst_13 [1] : vector<32x128xf32> to vector<32xf32>
    %25 = vector.shape_cast %24 : vector<32xf32> to vector<32x1xf32>
    %26 = vector.broadcast %25 : vector<32x1xf32> to vector<32x128xf32>
    %27 = arith.divf %23, %26 : vector<32x128xf32>
    %28 = vector.extract_strided_slice %27 {offsets = [0, 0], sizes = [32, 10], strides = [1, 1]} : vector<32x128xf32> to vector<32x10xf32>
    %c0_14 = arith.constant 0 : index
    %c0_15 = arith.constant 0 : index
    %29 = vector.load %arg6[%c0_14, %c0_15] : memref<32x10xf32, #tpu.memory_space<vmem>>, vector<32x10xf32>
    tpu.vector_store %arg6[%c0_14, %c0_15], %28 {strides = array<i32>} : memref<32x10xf32, #tpu.memory_space<vmem>>, vector<32x10xf32>,
    return
  }
  func.func @transform_0(%arg0: i32) -> (i32, i32) {
    %c0_i32 = arith.constant 0 : i32
    %c0_i32_0 = arith.constant 0 : i32
    return %arg0, %c0_i32 : i32, i32
  }
  func.func @transform_1(%arg0: i32) -> (i32, i32) {
    %c0_i32 = arith.constant 0 : i32
    %c0_i32_0 = arith.constant 0 : i32
    %c0_i32_1 = arith.constant 0 : i32
    return %c0_i32, %c0_i32_0 : i32, i32
  }
  func.func @transform_2(%arg0: i32) -> (i32, i32) {
    %c0_i32 = arith.constant 0 : i32
    %c0_i32_0 = arith.constant 0 : i32
    %c0_i32_1 = arith.constant 0 : i32
    return %c0_i32, %c0_i32_0 : i32, i32
  }
  func.func @transform_3(%arg0: i32) -> (i32, i32) {
    %c0_i32 = arith.constant 0 : i32
    %c0_i32_0 = arith.constant 0 : i32
    %c0_i32_1 = arith.constant 0 : i32
    return %c0_i32, %c0_i32_0 : i32, i32
  }
  func.func @transform_4(%arg0: i32) -> (i32, i32) {
    %c0_i32 = arith.constant 0 : i32
    %c0_i32_0 = arith.constant 0 : i32
    %c0_i32_1 = arith.constant 0 : i32
    return %c0_i32, %c0_i32_0 : i32, i32
  }
  func.func @transform_5(%arg0: i32) -> (i32, i32) {
    %c0_i32 = arith.constant 0 : i32
    %c0_i32_0 = arith.constant 0 : i32
    return %arg0, %c0_i32 : i32, i32
  }
}

</mosaic_0001>

<bundles_post_ra>
// kernel: tpu_custom_call.1
= control target key start
LH: loop header
LB: loop body
LE: loop exit
PB: predicated region body
PF: predicated region fallthrough
CT: control target
= control target key end

     0   :  { %10 = vsyncpa [#allocation3], 0  ;;  %s1924_s0 = inlined_call_operand.hbm [shape: f32[64,784], index: 0, kind: input, shape index: {}]   ;;  %s1925_s1 = inlined_call_operand.hbm [shape: bf16[784,128], index: 1, kind: input, shape index: {}]   ;;  %s1926_s2 = inlined_call_operand.vmem [shape: f32[1,128], index: 2, kind: input, shape index: {}]   ;;  %s1927_s3 = inlined_call_operand.hbm [shape: bf16[128,128], index: 3, kind: input, shape index: {}]   ;;  %s1928_s4 = inlined_call_operand.vmem [shape: f32[1,128], index: 4, kind: input, shape index: {}]   ;;  %s1929_s5 = inlined_call_operand.vmem [shape: f32[64,10], index: 5, kind: output, shape index: {}]  }
   0x1   :  { %12 = vsyncpa [#allocation3 + $0x1], 0 }
   0x2   :  { %13 = vsyncpa [#allocation5], 0  ;;  %s1710_s18 = smov 0   ;;  %s1712_s19 = smov 0  }
   0x3   :  { %s1714_s20 = smov 0   ;;  %s1716_s21 = smov 0  }
   0x4 LB: > { %s1191_s22 = sadd.s32 4294967295, %s1671_s21   ;;  %p39_p0 = scmp.ne.s32.totalorder %s1663_s19, %s1659_s18  ;;  %s1671_s21 = sphi %s1716_s21, %s1945_s21   ;;  %s1667_s20 = sphi %s1714_s20, %s1944_s20   ;;  %s1663_s19 = sphi %s1712_s19, %s1943_s19   ;;  %s1659_s18 = sphi %s1710_s18, %s1942_s18  }
   0x5   : > { %p1732_p1 = scmp.eq.s32.totalorder %s1191_s22, 0  ;;  %p1193_p2 = scmp.ge.s32.totalorder %s1671_s21, 1 }
   0x6   : > { %p160_p3 = scmp.lt.s32.totalorder %s1671_s21, 3  ;;  %s1673_s26 = smov [#allocation4]  }
   0x7   : > { %s1934_s23 = scalar_select %p1732_p1, 1, 0 }
   0x8   : > { %p1740_p4 = por %p1732_p1, %p39_p0  ;;  %p1744_p5 = pnand %p1193_p2, %p160_p3 }
   0x9   : > { %s172_s27 = sshll.u32 %s1673_s26, 4  ;;  %s1674_s29 = smov [#allocation6]   ;;  %s173_s27 = int_to_ptr.vmem [resolvable:$true] %s172_s27 }
   0xa   : > { %s1935_s24 = scalar_select %p1740_p4, 1, 0 }
   0xb   : > { %s1936_s25 = scalar_select %p1744_p5, 1, 0 }
   0xc   : > { %p1404_p6 = pneg %p1744_p5  ;;  %s188_s30 = sshll.u32 %s1674_s29, 4  ;;  %s1756_s30 = int_to_ptr.vmem [resolvable:$true] %s188_s30 }
   0xd   : > { %s1547_s8 = scalar_lea.hbm %s1925_s1, 6272 }
   0xe   : > { %p1752_p7 = pnand %p1404_p6, %p1732_p1  ;;  %p1548_p8 = scmp.ne.s32.totalorder %s1925_s1, %s1547_s8 }
   0xf   : > { %p1554_p12 = scmp.lt.u32.totalorder %s1547_s8, %s1925_s1 }
  0x10   : > { %p1549_p9 = pneg %p1752_p7 }
  0x12   : > { %p1550_p10 = pnand %p1549_p9, %p1548_p8 }
  0x14   : > { %p1551_p11 = pneg %p1550_p10 }
  0x16   : > { %p1556_p13 = pnand %p1554_p12, %p1551_p11 }
  0x18   : > { %1559 = shalt.err (!%p1556_p13)
}
  0x19   : > { %s1560_s13 = scalar_lea.vmem %s173_s27, 6272  ;;  %p1568_p6 = scmp.lt.s32.totalorder %s173_s27, %s173_s27 }
  0x1a   : > { %p1561_p0 = scmp.ne.s32.totalorder %s173_s27, %s1560_s13  ;;  %p1569_p1 = scmp.lt.s32.totalorder %s1560_s13, %s1560_s13 }
  0x1c   : > { %p1563_p2 = pnand %p1561_p0, %p1549_p9  ;;  %p1570_p4 = por %p1569_p1, %p1568_p6 }
  0x1e   : > { %p1564_p3 = pneg %p1563_p2 }
  0x20   : > { %p1571_p5 = pnand %p1570_p4, %p1564_p3 }
  0x22   : > { %1574 = shalt.err (!%p1571_p5)
}
  0x23   : > { %s1675_s14 = smov 64   ;;  %s1676_s15 = smov 4  }
  0x24   : > { %1407 = dma.hbm_to_vmem [thread:$0]  (!%p1752_p7), %s1925_s1, 6272, %s173_s27, [#allocation5], %s1675_s14, %s1675_s14, %s1676_s15  }
  0x25   : > { %s1575_s29 = scalar_lea.hbm %s1927_s3, 1024 }
  0x26   : > { %p1576_p8 = scmp.ne.s32.totalorder %s1927_s3, %s1575_s29  ;;  %p1582_p5 = scmp.lt.u32.totalorder %s1575_s29, %s1927_s3 }
  0x28   : > { %p1578_p1 = pnand %p1576_p8, %p1549_p9 }
  0x2a   : > { %p1579_p4 = pneg %p1578_p1 }
  0x2c   : > { %p1584_p10 = pnand %p1582_p5, %p1579_p4 }
  0x2e   : > { %1587 = shalt.err (!%p1584_p10)
}
  0x2f   : > { %s1588_s27 = scalar_lea.vmem %s1756_s30, 1024  ;;  %p1596_p0 = scmp.lt.s32.totalorder %s1756_s30, %s1756_s30 }
  0x30   : > { %p1589_p11 = scmp.ne.s32.totalorder %s1756_s30, %s1588_s27  ;;  %p1597_p2 = scmp.lt.s32.totalorder %s1588_s27, %s1588_s27 }
  0x32   : > { %p1591_p12 = pnand %p1589_p11, %p1549_p9  ;;  %p1598_p3 = por %p1597_p2, %p1596_p0 }
  0x34   : > { %p1592_p13 = pneg %p1591_p12 }
  0x36   : > { %p1599_p6 = pnand %p1598_p3, %p1592_p13 }
  0x38   : > { %1602 = shalt.err (!%p1599_p6)
}
  0x39   : > { %1410 = dma.hbm_to_vmem [thread:$0]  (!%p1752_p7), %s1927_s3, 1024, %s1756_s30, [#allocation5], %s1675_s14, %s1675_s14, %s1676_s15  }
  0x3a   : > { %s1806_s12 = sadd.s32 1, %s1671_s21   ;;  %s26_s13 = sadd.s32 1, %s1667_s20 }
  0x3b   : > { %s23_s28 = ssub.s32 %s1671_s21, %s1806_s12  ;;  %p33_p9 = scmp.ne.s32.totalorder %s1667_s20, %s1663_s19 }
  0x3c   : > { %p24_p8 = scmp.eq.s32.totalorder %s23_s28, 0  ;;  %p34_p1 = scmp.eq.s32.totalorder %s1671_s21, 0 }
  0x3d   : > { %p1417_p4 = scmp.lt.s32.totalorder %s1671_s21, 2  ;;  %s205_s16 = sand.u32 1, %s1667_s20  }
  0x3e   : > { %s1817_s17 = scalar_select %p24_p8, %s1667_s20, %s26_s13  }
  0x3f   : > { %p35_p5 = por %p34_p1, %p33_p9  ;;  %s1391_s18 = smul.u32 224, %s205_s16 }
  0x40   : > { %s1392_s26 = smul.u32 3584, %s1671_s21  ;;  %s1831_s8 = scalar_lea.sflag [#allocation3], %s205_s16 }
  0x41   : > { %p1820_p10 = pnand %p1417_p4, %p35_p5  ;;  %s209_s6 = scalar_lea.vmem [#allocation2], %s1391_s18 }
  0x42   : > { %s1827_s15 = scalar_lea.hbm %s1924_s0, %s1392_s26  ;;  %s217_s7 = sshll.u32 %s209_s6, 4  ;;  %s1829_s7 = int_to_ptr.vmem [resolvable:$true] %s217_s7 }
  0x43   : > { %s1603_s9 = scalar_lea.hbm %s1827_s15, 3584  ;;  %p1605_p11 = pneg %p1820_p10 }
  0x44   : > { %p1604_p7 = scmp.ne.s32.totalorder %s1827_s15, %s1603_s9  ;;  %s1608_s11 = scalar_lea.hbm %s1924_s0, 7168 }
  0x45   : > { %p1609_p0 = scmp.lt.u32.totalorder %s1827_s15, %s1924_s0  ;;  %p1610_p2 = scmp.lt.u32.totalorder %s1608_s11, %s1603_s9 }
  0x46   : > { %p1606_p12 = pnand %p1605_p11, %p1604_p7  ;;  %p1612_p6 = scmp.lt.u32.totalorder %s1603_s9, %s1827_s15 }
  0x47   : > { %p1611_p3 = por %p1610_p2, %p1609_p0 }
  0x48   : > { %p1607_p13 = pneg %p1606_p12 }
  0x49   : > { %p1613_p9 = por %p1612_p6, %p1611_p3 }
  0x4b   : > { %p1614_p8 = pnand %p1613_p9, %p1607_p13 }
  0x4d   : > { %1617 = shalt.err (!%p1614_p8)
}
  0x4e   : > { %s1618_s16 = scalar_lea.vmem %s1829_s7, 3584  ;;  %s1677_s18 = smov [#allocation2]  }
  0x4f   : > { %p1619_p1 = scmp.ne.s32.totalorder %s1829_s7, %s1618_s16  ;;  %s1623_s26 = sshll.u32 %s1677_s18, 4  ;;  %s1624_s26 = int_to_ptr.vmem [resolvable:$false] %s1623_s26 }
  0x50   : > { %s1625_s30 = scalar_lea.vmem %s1624_s26, 7168  ;;  %p1626_p7 = scmp.lt.s32.totalorder %s1829_s7, %s1624_s26 }
  0x51   : > { %p1621_p4 = pnand %p1619_p1, %p1605_p11  ;;  %p1627_p12 = scmp.lt.s32.totalorder %s1625_s30, %s1618_s16 }
  0x53   : > { %p1622_p5 = pneg %p1621_p4  ;;  %p1628_p0 = por %p1627_p12, %p1626_p7 }
  0x55   : > { %p1629_p2 = pnand %p1628_p0, %p1622_p5 }
  0x57   : > { %1632 = shalt.err (!%p1629_p2)
}
  0x58   : > { %s1678_s14 = smov 896   ;;  %s1679_s6 = smov 56  }
  0x59   : > { %1414 = dma.hbm_to_vmem [thread:$0]  (!%p1820_p10), %s1827_s15, 3584, %s1829_s7, %s1831_s8, %s1678_s14, %s1678_s14, %s1679_s6  }
  0x5a   : > { %p1939_p11 = scmp.ne.s32.totalorder %s1936_s25, 0 }
  0x5b   : > { %s231_s9 = sand.u32 (!%p1939_p11), 1, %s1663_s19   ;;  %p1940_p13 = scmp.ne.s32.totalorder (!%p1939_p11), %s1935_s24, 0 }
  0x5c   : > { %229 = sbr.rel (%p1939_p11) target bundleno = 963 (0x3c3), region = 40  ;;  %s232_s10 = scalar_lea.sflag (!%p1939_p11), [#allocation3], %s231_s9 }
  0x5d   : > { %s1393_s27 = smul.u32 (!%p1939_p11), 224, %s231_s9 }
  0x5f   : > { %s1862_s11 = scalar_lea.vmem (!%p1939_p11), [#allocation2], %s1393_s27 }
  0x63   : > { %1650 = dma.done.wait (%p1940_p13), %s232_s10, 3584  }
  0x64   : > { %1652 = vsyncadd (%p1940_p13), %s232_s10, 4294963712  ;;  %p1941_p3 = scmp.ne.s32.totalorder %s1934_s23, 0 }
  0x66   : > { %1654 = dma.done.wait (%p1941_p3), [#allocation5], 7296  }
  0x67   : > { %1656 = vsyncadd (%p1941_p3), [#allocation5], 4294960000  ;;  %v1458_v0 = vld [vmem:[#allocation4 + $0x40] sm:$0xff]   ;;  %v1462_v4 = vld [vmem:[#allocation4 + $0x48] sm:$0xff]   ;;  %vm719_vm0 = vcmask 130048   ;;  %s1203_s15 = sshll.u32 %s1191_s22, 2 }
  0x68   : > { %v1459_v1 = vld [vmem:[#allocation4] sm:$0xff]   ;;  %1268 = vmatprep.subr.bf16.mxu0 %v1458_v0  ;;  %v1463_v5 = vld [vmem:[#allocation4 + $0x8] sm:$0xff]   ;;  %v1466_v8 = vld [vmem:[#allocation4 + $0x50] sm:$0xff]   ;;  %p272_p10 = scmp.lt.s32.totalorder %s1203_s15, 7  ;;  %vm1100_vm1 = vcmask 80896  }
  0x69   : > { %v1460_v2 = vld [vmem:[#allocation4 + $0xc0] sm:$0xff]   ;;  %1269 = vmatpush3.bf16.msra.mxu0 %v1459_v1  ;;  %v1464_v6 = vld [vmem:[#allocation4 + $0xc8] sm:$0xff]   ;;  %v1467_v9 = vld [vmem:[#allocation4 + $0x10] sm:$0xff]  }
  0x6a   : > { %v1461_v3 = vld [vmem:[#allocation4 + $0x80] sm:$0xff]   ;;  %1296 = vmatprep.subr.bf16.mxu1 %v1460_v2  ;;  %1270 = vmatprep.subr.bf16.mxu0 %v1462_v4  ;;  %v1465_v7 = vld [vmem:[#allocation4 + $0x88] sm:$0xff]   ;;  %v1468_v10 = vld [vmem:[#allocation4 + $0xd0] sm:$0xff]   ;;  %s1947_s15 = smov (!%p272_p10, %s1203_s15), 7 }
  0x6b   : > { %1297 = vmatpush3.bf16.msra.mxu1 %v1461_v3  ;;  %v1469_v11 = vld [vmem:[#allocation4 + $0x90] sm:$0xff]   ;;  %v1470_v12 = vld [vmem:[#allocation4 + $0x58] sm:$0xff]   ;;  %v1474_v16 = vld [vmem:[#allocation4 + $0x60] sm:$0xff]   ;;  %s1204_s7 = sshll.u32 %s1947_s15, 3 }
  0x6c   : > { %1298 = vmatprep.subr.bf16.mxu1 %v1464_v6  ;;  %v1471_v13 = vld [vmem:[#allocation4 + $0x18] sm:$0xff]   ;;  %v1475_v17 = vld [vmem:[#allocation4 + $0x20] sm:$0xff]   ;;  %v1478_v20 = vld [vmem:[#allocation4 + $0x68] sm:$0xff]   ;;  %s275_s28 = scalar_lea.vmem %s1929_s5, %s1204_s7 }
  0x6d   : > { %1271 = vmatpush3.bf16.msra.mxu0 %v1463_v5  ;;  %v1472_v14 = vld [vmem:[#allocation4 + $0xd8] sm:$0xff]   ;;  %v1476_v18 = vld [vmem:[#allocation4 + $0xe0] sm:$0xff]   ;;  %v1479_v21 = vld [vmem:[#allocation4 + $0x28] sm:$0xff]  }
  0x6e   : > { %1272 = vmatprep.subr.bf16.mxu0 %v1466_v8  ;;  %v1473_v15 = vld [vmem:[#allocation4 + $0x98] sm:$0xff]   ;;  %v1477_v19 = vld [vmem:[#allocation4 + $0xa0] sm:$0xff]   ;;  %v1480_v22 = vld [vmem:[#allocation4 + $0xe8] sm:$0xff]  }
  0x6f   : > { %1299 = vmatpush3.bf16.msra.mxu1 %v1465_v7  ;;  %v1481_v23 = vld [vmem:[#allocation4 + $0xa8] sm:$0xff]   ;;  %v1482_v24 = vld [vmem:[#allocation4 + $0x70] sm:$0xff]   ;;  %v1486_v28 = vld [vmem:[#allocation4 + $0x78] sm:$0xff]  }
  0x70   : > { %1300 = vmatprep.subr.bf16.mxu1 %v1468_v10  ;;  %v1483_v25 = vld [vmem:[#allocation4 + $0x30] sm:$0xff]   ;;  %v1487_v29 = vld [vmem:[#allocation4 + $0x38] sm:$0xff]   ;;  %v279_v31 = vld [vmem:[%s1862_s11 + $0x8] sm:$0xff] }
  0x71   : > { %1273 = vmatpush3.bf16.msra.mxu0 %v1467_v9  ;;  %v1484_v26 = vld [vmem:[#allocation4 + $0xf0] sm:$0xff]   ;;  %v1488_v30 = vld [vmem:[#allocation4 + $0xf8] sm:$0xff]   ;;  %v286_v32 = vld [vmem:[%s1862_s11 + $0x40] sm:$0xff] }
  0x72   : > { %1274 = vmatprep.subr.bf16.mxu0 %v1470_v12  ;;  %v1485_v27 = vld [vmem:[#allocation4 + $0xb0] sm:$0xff]   ;;  %v307_v33 = vpack.c.bf16 %v286_v32, %v279_v31  ;;  %v1489_v34 = vld [vmem:[#allocation4 + $0xb8] sm:$0xff]   ;;  %v278_v35 = vld [vmem:[%s1862_s11] sm:$0xff] }
  0x73   : > { %1301 = vmatpush3.bf16.msra.mxu1 %v1469_v11  ;;  %v285_v36 = vld [vmem:[%s1862_s11 + $0x38] sm:$0xff]  ;;  %v1490_v38 = vld [vmem:[#allocation4 + $0x140] sm:$0xff]   ;;  %v288_v40 = vld [vmem:[%s1862_s11 + $0x50] sm:$0xff] }
  0x74   : > { %1302 = vmatprep.subr.bf16.mxu1 %v1472_v14  ;;  %758 = vmatprep.mubr.bf16.mxu0 %v307_v33  ;;  %v306_v37 = vpack.c.bf16 %v285_v36, %v278_v35  ;;  %v281_v39 = vld [vmem:[%s1862_s11 + $0x18] sm:$0xff]  ;;  %v1491_v42 = vld [vmem:[#allocation4 + $0x100] sm:$0xff]   ;;  %v280_v43 = vld [vmem:[%s1862_s11 + $0x10] sm:$0xff] }
  0x75   : > { %1275 = vmatpush3.bf16.msra.mxu0 %v1471_v13  ;;  %v309_v41 = vpack.c.bf16 %v288_v40, %v281_v39  ;;  %v287_v44 = vld [vmem:[%s1862_s11 + $0x48] sm:$0xff]  ;;  %v1494_v48 = vld [vmem:[#allocation4 + $0x150] sm:$0xff]   ;;  %v1496_v50 = vld [vmem:[#allocation4 + $0x158] sm:$0xff]  }
  0x76   : > { %1276 = vmatprep.subr.bf16.mxu0 %v1474_v16  ;;  %v308_v45 = vpack.c.bf16 %v287_v44, %v280_v43  ;;  %v1492_v46 = vld [vmem:[#allocation4 + $0x148] sm:$0xff]   ;;  %v1495_v49 = vld [vmem:[#allocation4 + $0x110] sm:$0xff]   ;;  %v1497_v51 = vld [vmem:[#allocation4 + $0x118] sm:$0xff]  }
  0x77   : > { %1303 = vmatpush3.bf16.msra.mxu1 %v1473_v15  ;;  %807 = vmatprep.mubr.bf16.mxu1 %v309_v41  ;;  %v1493_v47 = vld [vmem:[#allocation4 + $0x108] sm:$0xff]   ;;  %v293_v52 = vld [vmem:[%s1862_s11 + $0x78] sm:$0xff]  ;;  %v300_v53 = vld [vmem:[%s1862_s11 + $0xb0] sm:$0xff] }
  0x78   : > { %1304 = vmatprep.subr.bf16.mxu1 %v1476_v18  ;;  %v1498_v54 = vld [vmem:[#allocation4 + $0x160] sm:$0xff]   ;;  %v314_v55 = vpack.c.bf16 %v300_v53, %v293_v52  ;;  %v292_v56 = vld [vmem:[%s1862_s11 + $0x70] sm:$0xff]  ;;  %v299_v57 = vld [vmem:[%s1862_s11 + $0xa8] sm:$0xff] }
  0x79   : > { %1277 = vmatpush3.bf16.msra.mxu0 %v1475_v17  ;;  %v1499_v58 = vld [vmem:[#allocation4 + $0x120] sm:$0xff]   ;;  %v313_v59 = vpack.c.bf16 %v299_v57, %v292_v56  ;;  %v295_v60 = vld [vmem:[%s1862_s11 + $0x88] sm:$0xff]  ;;  %v301_v0 = vld [vmem:[%s1862_s11 + $0xb8] sm:$0xff] }
  0x7a   : > { %1278 = vmatprep.subr.bf16.mxu0 %v1478_v20  ;;  %v302_v61 = vld [vmem:[%s1862_s11 + $0xc0] sm:$0xff]  ;;  %v1500_v1 = vld [vmem:[#allocation4 + $0x168] sm:$0xff]   ;;  %v1502_v5 = vld [vmem:[#allocation4 + $0x170] sm:$0xff]  }
  0x7b   : > { %1305 = vmatpush3.bf16.msra.mxu1 %v1477_v19  ;;  %v294_v62 = vld [vmem:[%s1862_s11 + $0x80] sm:$0xff]  ;;  %v316_v63 = vpack.c.bf16 %v302_v61, %v295_v60  ;;  %v1501_v4 = vld [vmem:[#allocation4 + $0x128] sm:$0xff]   ;;  %v284_v9 = vld [vmem:[%s1862_s11 + $0x30] sm:$0xff] }
  0x7c   : > { %1306 = vmatprep.subr.bf16.mxu1 %v1480_v22  ;;  %v315_v2 = vpack.c.bf16 %v301_v0, %v294_v62  ;;  %v1504_v3 = vld [vmem:[#allocation4 + $0x180] sm:$0xff]   ;;  %v283_v6 = vld [vmem:[%s1862_s11 + $0x28] sm:$0xff]  ;;  %v305_v12 = vld [vmem:[%s1862_s11 + $0xd8] sm:$0xff] }
  0x7d   : > { %1279 = vmatpush3.bf16.msra.mxu0 %v1479_v21  ;;  %v290_v7 = vld [vmem:[%s1862_s11 + $0x60] sm:$0xff]  ;;  %v291_v10 = vld [vmem:[%s1862_s11 + $0x68] sm:$0xff]  ;;  %v1503_v13 = vld [vmem:[#allocation4 + $0x130] sm:$0xff]  }
  0x7e   : > { %1280 = vmatprep.subr.bf16.mxu0 %v1482_v24  ;;  %v311_v8 = vpack.c.bf16 %v290_v7, %v283_v6  ;;  %v298_v11 = vld [vmem:[%s1862_s11 + $0xa0] sm:$0xff]  ;;  %v312_v14 = vpack.c.bf16 %v291_v10, %v284_v9  ;;  %v1505_v16 = vld [vmem:[#allocation4 + $0x178] sm:$0xff]   ;;  %v304_v21 = vld [vmem:[%s1862_s11 + $0xd0] sm:$0xff] }
  0x7f   : > { %1307 = vmatpush3.bf16.msra.mxu1 %v1481_v23  ;;  %v319_v15 = vpack.c.bf16 %v305_v12, %v298_v11  ;;  %v1506_v17 = vld [vmem:[#allocation4 + $0x138] sm:$0xff]   ;;  %v282_v18 = vld [vmem:[%s1862_s11 + $0x20] sm:$0xff]  ;;  %v296_v24 = vld [vmem:[%s1862_s11 + $0x90] sm:$0xff] }
  0x80   : > { %1308 = vmatprep.subr.bf16.mxu1 %v1484_v26  ;;  %v289_v19 = vld [vmem:[%s1862_s11 + $0x58] sm:$0xff]  ;;  %v1511_v31 = vld [vmem:[#allocation6 + $0x20] sm:$0xff]   ;;  %v1512_v32 = vld [vmem:[#allocation6 + $0x28] sm:$0xff]  }
  0x81   : > { %1281 = vmatpush3.bf16.msra.mxu0 %v1483_v25  ;;  %v297_v20 = vld [vmem:[%s1862_s11 + $0x98] sm:$0xff]  ;;  %v310_v22 = vpack.c.bf16 %v289_v19, %v282_v18  ;;  %v303_v25 = vld [vmem:[%s1862_s11 + $0xc8] sm:$0xff]  ;;  %v1205_v36 = vld [vmem:[%s1926_s2] ss:$0 sm:$0xff] }
  0x82   : > { %1282 = vmatprep.subr.bf16.mxu0 %v1486_v28  ;;  %v318_v23 = vpack.c.bf16 %v304_v21, %v297_v20  ;;  %v317_v26 = vpack.c.bf16 %v303_v25, %v296_v24  ;;  %v1508_v28 = vld [vmem:[#allocation6 + $0x8] sm:$0xff]   ;;  %v1513_v33 = vld [vmem:[#allocation6 + $0x30] sm:$0xff]  }
  0x83   : > { %1309 = vmatpush3.bf16.msra.mxu1 %v1485_v27  ;;  %v1507_v27 = vld [vmem:[#allocation6] sm:$0xff]  }
  0x84   : > { %1310 = vmatprep.subr.bf16.mxu1 %v1488_v30  ;;  %v1510_v30 = vld [vmem:[#allocation6 + $0x18] sm:$0xff]  }
  0x85   : > { %1283 = vmatpush3.bf16.msra.mxu0 %v1487_v29  ;;  %v1509_v29 = vld [vmem:[#allocation6 + $0x10] sm:$0xff]  }
  0x86   : > { %1324 = vmatprep.subr.bf16.mxu0 %v1490_v38 }
  0x87   : > { %1311 = vmatpush3.bf16.msra.mxu1 %v1489_v34  ;;  %v1514_v34 = vld [vmem:[#allocation6 + $0x38] sm:$0xff]  }
  0x88   : > { %759 = vmatmul.mubr.bf16.vlgmr.msra.gmra.mrb[0].mxu0 %v306_v37  ;;  %1365 = vmatprep.subr.bf16.mxu1 %v1504_v3 }
  0x89   : > { %1325 = vmatpush3.bf16.msra.mxu0 %v1491_v42  ;;  %766 = vmatprep.mubr.bf16.mxu0 %v314_v55 }
  0x8a   : > { %808 = vmatmul.mubr.bf16.vlgmr.msra.gmra.mrb[0].mxu1 %v308_v45  ;;  %1326 = vmatprep.subr.bf16.mxu0 %v1492_v46 }
  0x8b   : > { %815 = vmatprep.mubr.bf16.mxu1 %v316_v63  ;;  %1366 = vmatpush3.bf16.msra.mxu1 %v1504_v3 }
  0x8c   : > { %1371 = vmatprep.subr.bf16.mxu1 %v1507_v27 }
  0x8d   : > { %1327 = vmatpush3.bf16.msra.mxu0 %v1493_v47 }
  0x8e   : > { %1328 = vmatprep.subr.bf16.mxu0 %v1494_v48 }
  0x90   : > { %767 = vmatmul.mubr.bf16.gmra.mrb[4].mxu0 %v313_v59 }
  0x91   : > { %1329 = vmatpush3.bf16.msra.mxu0 %v1495_v49  ;;  %856 = vmatprep.mubr.bf16.mxu0 %v311_v8 }
  0x92   : > { %1330 = vmatprep.subr.bf16.mxu0 %v1496_v50  ;;  %816 = vmatmul.mubr.bf16.gmra.mrb[4].mxu1 %v315_v2 }
  0x93   : > { %1367 = vmatprep.mubr.msk.bf16.mxu1 %vm719_vm0, %v312_v14 }
  0x95   : > { %1331 = vmatpush3.bf16.msra.mxu0 %v1497_v51 }
  0x96   : > { %1332 = vmatprep.subr.bf16.mxu0 %v1498_v54 }
  0x99   : > { %1333 = vmatpush3.bf16.msra.mxu0 %v1499_v58 }
  0x9a   : > { %1334 = vmatprep.subr.bf16.mxu0 %v1500_v1  ;;  %1368 = vmatmul.mubr.msk.bf16.vlgmr.msra.gmra.mrb[8].mxu1 %vm719_vm0, %v319_v15 }
  0x9b   : > { %1372 = vmatpush3.bf16.msra.mxu1 %v1507_v27 }
  0x9c   : > { %1373 = vmatprep.subr.bf16.mxu1 %v1508_v28 }
  0x9d   : > { %1335 = vmatpush3.bf16.msra.mxu0 %v1501_v4 }
  0x9e   : > { %1336 = vmatprep.subr.bf16.mxu0 %v1502_v5 }
  0x9f   : > { %1374 = vmatpush3.bf16.msra.mxu1 %v1508_v28 }
  0xa0   : > { %1375 = vmatprep.subr.bf16.mxu1 %v1509_v29 }
  0xa1   : > { %1337 = vmatpush3.bf16.msra.mxu0 %v1503_v13 }
  0xa2   : > { %1338 = vmatprep.subr.bf16.mxu0 %v1505_v16 }
  0xa3   : > { %1376 = vmatpush3.bf16.msra.mxu1 %v1509_v29 }
  0xa4   : > { %1377 = vmatprep.subr.bf16.mxu1 %v1510_v30 }
  0xa5   : > { %1339 = vmatpush3.bf16.msra.mxu0 %v1506_v17 }
  0xa7   : > { %1378 = vmatpush3.bf16.msra.mxu1 %v1510_v30 }
  0xa8   : > { %857 = vmatmul.mubr.bf16.vlgmr.msra.gmra.mrb[8].mxu0 %v310_v22  ;;  %1379 = vmatprep.subr.bf16.mxu1 %v1511_v31 }
  0xa9   : > { %864 = vmatprep.mubr.bf16.mxu0 %v318_v23 }
  0xab   : > { %1380 = vmatpush3.bf16.msra.mxu1 %v1511_v31 }
  0xac   : > { %1381 = vmatprep.subr.bf16.mxu1 %v1512_v32 }
  0xaf   : > { %1382 = vmatpush3.bf16.msra.mxu1 %v1512_v32 }
  0xb0   : > { %865 = vmatmul.mubr.bf16.gmra.mrb[12].mxu0 %v317_v26  ;;  %1383 = vmatprep.subr.bf16.mxu1 %v1513_v33 }
  0xb3   : > { %1384 = vmatpush3.bf16.msra.mxu1 %v1513_v33 }
  0xb4   : > { %1385 = vmatprep.subr.bf16.mxu1 %v1514_v34 }
  0xb7   : > { %1386 = vmatpush3.bf16.msra.mxu1 %v1514_v34 }
 0x15b   : > { %v1284_v35 = vpop.f32.mrb[0].mxu0 }
 0x15c   : > { %v1285_v37 = vpop.f32.mrb[1].mxu0 }
 0x15d   : > { %v1286_v38 = vadd.f32 %v1285_v37, %v1284_v35  ;;  %v1287_v39 = vpop.f32.mrb[2].mxu0  ;;  %v1312_v40 = vpop.f32.mrb[0].mxu1 }
 0x15e   : > { %v1288_v41 = vpop.f32.mrb[3].mxu0  ;;  %v1313_v44 = vpop.f32.mrb[1].mxu1 }
 0x15f   : > { %v761_v42 = vadd.f32 %v1286_v38, %v1205_v36  ;;  %v1289_v43 = vadd.f32 %v1288_v41, %v1287_v39  ;;  %v1314_v45 = vadd.f32 %v1313_v44, %v1312_v40  ;;  %v1315_v46 = vpop.f32.mrb[2].mxu1 }
 0x160   : > { %v1316_v48 = vpop.f32.mrb[3].mxu1 }
 0x161   : > { %v764_v47 = vadd.f32 %v1289_v43, %v1205_v36  ;;  %v810_v49 = vadd.f32 %v1314_v45, %v761_v42  ;;  %v1317_v50 = vadd.f32 %v1316_v48, %v1315_v46 }
 0x163   : > { %v813_v51 = vadd.f32 %v1317_v50, %v764_v47  ;;  %v1290_v52 = vpop.f32.mrb[4].mxu0  ;;  %v1257_v50 = vld [vmem:[%s1928_s4] ss:$0 sm:$0xff] }
 0x164   : > { %v1291_v53 = vpop.f32.mrb[5].mxu0 }
 0x165   : > { %v1292_v54 = vadd.f32 %v1291_v53, %v1290_v52  ;;  %v1293_v55 = vpop.f32.mrb[6].mxu0  ;;  %v1318_v56 = vpop.f32.mrb[4].mxu1 }
 0x166   : > { %v1294_v57 = vpop.f32.mrb[7].mxu0  ;;  %v1319_v58 = vpop.f32.mrb[5].mxu1 }
 0x167   : > { %v769_v59 = vadd.f32 %v1292_v54, %v1205_v36  ;;  %v1295_v60 = vadd.f32 %v1294_v57, %v1293_v55  ;;  %v1320_v61 = vadd.f32 %v1319_v58, %v1318_v56  ;;  %v1321_v62 = vpop.f32.mrb[6].mxu1 }
 0x168   : > { %v1322_v63 = vpop.f32.mrb[7].mxu1 }
 0x169   : > { %v772_v0 = vadd.f32 %v1295_v60, %v1205_v36  ;;  %v818_v1 = vadd.f32 %v1320_v61, %v769_v59  ;;  %v1323_v2 = vadd.f32 %v1322_v63, %v1321_v62 }
 0x16b   : > { %v821_v3 = vadd.f32 %v1323_v2, %v772_v0 }
 0x16d   : > { %v1369_v4 = vpop.f32.mrb[8].mxu1 }
 0x16e   : > { %v907_v5 = vpop.f32.mrb[9].mxu1 }
 0x16f   : > { %v1370_v6 = vpop.f32.mrb[10].mxu1 }
 0x170   : > { %v910_v7 = vpop.f32.mrb[11].mxu1 }
 0x17b   : > { %v1340_v8 = vpop.f32.mrb[8].mxu0 }
 0x17c   : > { %v1341_v9 = vpop.f32.mrb[9].mxu0 }
 0x17d   : > { %v1342_v10 = vadd.f32 %v1341_v9, %v1340_v8  ;;  %v1343_v11 = vpop.f32.mrb[10].mxu0 }
 0x17e   : > { %v1344_v12 = vpop.f32.mrb[11].mxu0 }
 0x17f   : > { %v1345_v13 = vadd.f32 %v1344_v12, %v1343_v11  ;;  %v859_v14 = vadd.f32 %v1342_v10, %v810_v49 }
 0x181   : > { %v908_v15 = vadd.f32 %v907_v5, %v859_v14  ;;  %v862_v16 = vadd.f32 %v1345_v13, %v813_v51 }
 0x183   : > { %v922_v17 = vsub.f32 0.0, %v908_v15  ;;  %v911_v18 = vadd.f32 %v910_v7, %v862_v16  ;;  %v1346_v19 = vpop.f32.mrb[12].mxu0 }
 0x184   : > { %v1347_v20 = vpop.f32.mrb[13].mxu0 }
 0x185   : > { %v926_v21 = vmul.f32 1.442695, %v922_v17  ;;  %v923_v22 = vsub.f32 0.0, %v911_v18  ;;  %v1348_v23 = vadd.f32 %v1347_v20, %v1346_v19  ;;  %v1349_v24 = vpop.f32.mrb[14].mxu0 }
 0x186   : > { %v1350_v25 = vpop.f32.mrb[15].mxu0 }
 0x187   : > { %1515 = vpow2.f32 %v926_v21  ;;  %v928_v26 = vmul.f32 1.442695, %v923_v22  ;;  %v867_v27 = vadd.f32 %v1348_v23, %v818_v1  ;;  %v1351_v28 = vadd.f32 %v1350_v25, %v1349_v24 }
 0x189   : > { %1517 = vpow2.f32 %v928_v26  ;;  %v916_v29 = vadd.f32 %v1369_v4, %v867_v27  ;;  %v870_v30 = vadd.f32 %v1351_v28, %v821_v3 }
 0x18b   : > { %v924_v31 = vsub.f32 0.0, %v916_v29  ;;  %v919_v32 = vadd.f32 %v1370_v6, %v870_v30 }
 0x18d   : > { %v930_v33 = vmul.f32 1.442695, %v924_v31  ;;  %v925_v34 = vsub.f32 0.0, %v919_v32 }
 0x18f   : > { %1519 = vpow2.f32 %v930_v33  ;;  %v932_v35 = vmul.f32 1.442695, %v925_v34 }
 0x191   : > { %v1516_v36 = vpop.eup %1515  ;;  %1521 = vpow2.f32 %v932_v35 }
 0x192   : > { %v934_v37 = vadd.f32 1.0, %v1516_v36 }
 0x193   : > { %v1518_v38 = vpop.eup %1517 }
 0x194   : > { %v935_v39 = vadd.f32 1.0, %v1518_v38  ;;  %1523 = vrcp.f32 %v934_v37 }
 0x196   : > { %1525 = vrcp.f32 %v935_v39 }
 0x199   : > { %v1520_v40 = vpop.eup %1519 }
 0x19a   : > { %v936_v41 = vadd.f32 1.0, %v1520_v40 }
 0x19b   : > { %v1522_v42 = vpop.eup %1521 }
 0x19c   : > { %v937_v43 = vadd.f32 1.0, %v1522_v42  ;;  %1527 = vrcp.f32 %v936_v41 }
 0x19e   : > { %1529 = vrcp.f32 %v937_v43  ;;  %v1524_v44 = vpop.eup %1523 }
 0x1a0   : > { %v1526_v45 = vpop.eup %1525 }
 0x1a1   : > { %v942_v46 = vpack.c.bf16 %v1526_v45, %v1524_v44 }
 0x1a3   : > { %1387 = vmatprep.mubr.bf16.mxu1 %v942_v46 }
 0x1a6   : > { %v1528_v47 = vpop.eup %1527 }
 0x1a8   : > { %v1530_v48 = vpop.eup %1529 }
 0x1a9   : > { %v943_v49 = vpack.c.bf16 %v1530_v48, %v1528_v47 }
 0x1ab   : > { %1388 = vmatmul.mubr.bf16.vlgmr.msra.gmra.mrb[12].mxu1 %v943_v49 }
 0x27e   : > { %v1389_v51 = vpop.f32.mrb[12].mxu1 }
 0x27f   : > { %v1058_v52 = vadd.f32 %v1389_v51, %v1257_v50  ;;  %v1049_v53 = vpop.f32.mrb[13].mxu1 }
 0x280   : > { %v1050_v54 = vadd.f32 %v1257_v50, %v1049_v53  ;;  %v1390_v55 = vpop.f32.mrb[14].mxu1 }
 0x281   : > { %1068 = vmax.xlane.f32.xlu1 %v1058_v52  ;;  %v1052_v56 = vpop.f32.mrb[15].mxu1  ;;  %v1061_v57 = vadd.f32 %v1390_v55, %v1257_v50 }
 0x282   : > { %1064 = vmax.xlane.f32.xlu0 %v1050_v54  ;;  %v1053_v58 = vadd.f32 %v1257_v50, %v1052_v56 }
 0x285   : > { %1070 = vmax.xlane.f32.xlu1 %v1061_v57 }
 0x286   : > { %1066 = vmax.xlane.f32.xlu0 %v1053_v58 }
 0x30e   : > { %v1069_v59 = vpop.xlane.xlu1 %1068 }
 0x30f   : > { %v1074_v60 = vsub.f32 %v1058_v52, %v1069_v59  ;;  %v1065_v61 = vpop.xlane.xlu0 %1064 }
 0x310   : > { %v1072_v62 = vsub.f32 %v1050_v54, %v1065_v61 }
 0x311   : > { %v1080_v1 = vmul.f32 1.442695, %v1074_v60 }
 0x312   : > { %v1076_v63 = vmul.f32 1.442695, %v1072_v62  ;;  %v1071_v0 = vpop.xlane.xlu1 %1070 }
 0x313   : > { %v1067_v2 = vpop.xlane.xlu0 %1066  ;;  %v1075_v3 = vsub.f32 %v1061_v57, %v1071_v0 }
 0x314   : > { %1531 = vpow2.f32 %v1076_v63  ;;  %v1073_v4 = vsub.f32 %v1053_v58, %v1067_v2 }
 0x315   : > { %1533 = vpow2.f32 %v1080_v1  ;;  %v1082_v6 = vmul.f32 1.442695, %v1075_v3 }
 0x316   : > { %v1078_v5 = vmul.f32 1.442695, %v1073_v4 }
 0x318   : > { %1535 = vpow2.f32 %v1078_v5 }
 0x319   : > { %1537 = vpow2.f32 %v1082_v6 }
 0x31e   : > { %v1532_v7 = vpop.eup %1531 }
 0x31f   : > { %1084 = vadd.xlane.f32.xlu0 %v1532_v7  ;;  %v1534_v8 = vpop.eup %1533 }
 0x322   : > { %v1536_v9 = vpop.eup %1535 }
 0x323   : > { %1088 = vadd.xlane.f32.xlu0 %v1534_v8  ;;  %1086 = vadd.xlane.f32.xlu1 %v1536_v9  ;;  %v1538_v10 = vpop.eup %1537 }
 0x327   : > { %1090 = vadd.xlane.f32.xlu1 %v1538_v10 }
 0x3ac   : > { %v1085_v11 = vpop.xlane.xlu0 %1084 }
 0x3ad   : > { %1539 = vrcp.f32 %v1085_v11 }
 0x3b0   : > { %v1087_v12 = vpop.xlane.xlu1 %1086  ;;  %v1089_v13 = vpop.xlane.xlu0 %1088 }
 0x3b1   : > { %1541 = vrcp.f32 %v1087_v12 }
 0x3b2   : > { %1543 = vrcp.f32 %v1089_v13 }
 0x3b4   : > { %v1091_v14 = vpop.xlane.xlu1 %1090 }
 0x3b5   : > { %1545 = vrcp.f32 %v1091_v14 }
 0x3b7   : > { %v1540_v15 = vpop.eup %1539 }
 0x3b8   : > { %v1093_v16 = vmul.f32 %v1540_v15, %v1532_v7 }
 0x3ba   : > { %1101 = vst.msk [vmem:[%s275_s28] sm:$0xff] %vm1100_vm1, %v1093_v16 }
 0x3bb   : > { %v1542_v17 = vpop.eup %1541 }
 0x3bc   : > { %v1544_v18 = vpop.eup %1543  ;;  %v1095_v19 = vmul.f32 %v1542_v17, %v1536_v9 }
 0x3bd   : > { %v1097_v20 = vmul.f32 %v1544_v18, %v1534_v8 }
 0x3be   : > { %1102 = vst.msk [vmem:[%s275_s28 + $0x8] sm:$0xff] %vm1100_vm1, %v1095_v19 }
 0x3bf   : > { %v1546_v21 = vpop.eup %1545  ;;  %1103 = vst.msk [vmem:[%s275_s28 + $0x10] sm:$0xff] %vm1100_vm1, %v1097_v20 }
 0x3c0   : > { %v1099_v22 = vmul.f32 %v1546_v21, %v1538_v10 }
 0x3c2   : > { %1104 = vst.msk [vmem:[%s275_s28 + $0x18] sm:$0xff] %vm1100_vm1, %v1099_v22 }
 0x3c3 PF: > { %p16_p6 = scmp.ge.s32.totalorder %s1806_s12, 4   ;;  %s1942_s18 = smov %s1663_s19 }
 0x3c4   : > { %s1943_s19 = smov %s1667_s20  ;;  %s1944_s20 = smov %s1817_s17 }
 0x3c5   : > { %s1945_s21 = smov %s1806_s12  ;;  %18 = sbr.rel (!%p16_p6) target bundleno = 4 (0x4), region = 88 }
 0x3cc   :  { %1127 = vsyncpa [#allocation3], 1 }
 0x3cd   :  { %1129 = vsyncpa [#allocation3 + $0x1], 1 }
 0x3ce   :  { %1130 = vsyncpa [#allocation5], 1 }

</bundles_post_ra>
